<compile_context>
chip_gen: v7x
topology: tpu7x:2x2x1
jax: 0.10.0
libtpu: 0.0.40
codegen_flags: <defaults>
</compile_context>

<pallas_src>
import functools
import math

import jax
import jax.numpy as jnp
from jax import lax
from jax.experimental import pallas as pl
from jax.experimental.pallas import tpu as pltpu


def _fused_flash_attn_kernel(x_ref, wq_ref, wk_ref, wv_ref, bout_ref, o_ref, *,
                             seq_block, num_sub_blocks, is_decoder,
                             compute_dtype, approx_recip):
    # x_ref  : (C, E)  C = num_sub_blocks * seq_block rows of the flattened (B*S, E) input
    # wq_ref : (E, H)  q projection, pre-transposed and pre-scaled by 1/sqrt(H)
    # wk_ref : (E, H)  k projection, pre-transposed
    # wv_ref : (E, H)  v projection folded with the output projection (W_v^T @ W_out^T)
    # bout_ref: (1, H) output-projection bias
    # o_ref  : (C, H)
    Tb = seq_block
    x = x_ref[...].astype(compute_dtype)                                   # (C, E)

    # Three lane-aligned MXU projections over the whole chunk (big M dim),
    # f32 accumulation.
    q = jnp.dot(x, wq_ref[...], preferred_element_type=jnp.float32)        # (C, H), pre-scaled
    k = jnp.dot(x, wk_ref[...], preferred_element_type=jnp.float32)        # (C, H)
    v = jnp.dot(x, wv_ref[...], preferred_element_type=jnp.float32)        # (C, H), already @ W_out^T

    bias = bout_ref[0]                                                     # (H,) f32

    # Static unrolled loop over the Tb-sized block-diagonal attention blocks
    # contained in this chunk (slices are sublane-aligned: Tb % 8 == 0).
    for s in range(num_sub_blocks):
        lo = s * Tb
        qs = q[lo:lo + Tb, :].astype(compute_dtype)
        ks = k[lo:lo + Tb, :].astype(compute_dtype)
        vs = v[lo:lo + Tb, :].astype(compute_dtype)

        # scores = (q / sqrt(H)) @ k^T, contracting the shared feature dim
        # directly (no transposed operand materialized).
        scores = lax.dot_general(
            qs, ks, dimension_numbers=(((1,), (1,)), ((), ())),
            preferred_element_type=jnp.float32)                            # (Tb, Tb)

        if is_decoder:
            # tril[i:i+Tb, i:i+Tb] of a lower-triangular ones matrix is a
            # causal mask within the block (diagonal always kept -> no
            # fully-masked rows).
            row = lax.broadcasted_iota(jnp.int32, (Tb, Tb), 0)
            col = lax.broadcasted_iota(jnp.int32, (Tb, Tb), 1)
            scores = jnp.where(row >= col, scores, -jnp.inf)

        # Softmax exactly as in the reference: max-sub, exp, /(sum + 1e-6),
        # all in f32; reciprocal on the EUP.
        scores = scores - jnp.max(scores, axis=-1, keepdims=True)
        scores = jnp.exp(scores)
        denom = jnp.sum(scores, axis=-1, keepdims=True) + 1e-6
        p = scores * pl.reciprocal(denom, approx=approx_recip)

        attn = jnp.dot(p.astype(compute_dtype), vs,
                       preferred_element_type=jnp.float32)                 # (Tb, H)
        o_ref[lo:lo + Tb, :] = (attn + bias).astype(o_ref.dtype)


def flash_attention_mps_forward(x, w_qkv, w_out, b_out, *, head_size,
                                is_decoder=False, block_size=128,
                                compute_dtype=jnp.bfloat16,
                                target_rows_per_step=512,
                                vmem_limit_bytes=None):
    """x: (B, S, E) f32; w_qkv: (3H, E); w_out: (H, H); b_out: (H,)."""
    B, S, E = x.shape
    H = head_size
    Tb = min(block_size, S)                      # effective attention block (module semantics)
    assert S % Tb == 0, "seq_len must be a multiple of the effective block size"
    assert Tb % 8 == 0, "effective block size must be a multiple of 8 (TPU sublane)"

    total_rows = B * S
    # Rows per grid step: the largest multiple of Tb that divides B*S and is
    # <= target_rows_per_step.  Chunks never split a Tb attention block, so
    # the block-diagonal attention semantics are preserved exactly.
    # (For large E on v7x, lower target_rows_per_step or raise vmem_limit_bytes.)
    C = Tb
    c = Tb
    while c <= max(Tb, target_rows_per_step):
        if total_rows % c == 0:
            C = c
        c += Tb
    num_sub = C // Tb

    w_qkv = jnp.asarray(w_qkv)                   # (3H, E)
    w_out = jnp.asarray(w_out)                   # (H, H)
    b_out = jnp.asarray(b_out)                   # (H,)
    w_q, w_k, w_v = w_qkv[0:H], w_qkv[H:2 * H], w_qkv[2 * H:3 * H]

    scale = 1.0 / math.sqrt(H)
    wq_t = (w_q.T * scale).astype(compute_dtype)                 # (E, H), pre-scaled
    wk_t = w_k.T.astype(compute_dtype)                           # (E, H)
    # Fold out-projection into V:  (p @ (x @ Wv^T)) @ Wout^T == p @ (x @ (Wv^T @ Wout^T))
    wv_fold = (w_v.T @ w_out.T).astype(compute_dtype)            # (E, H)
    bout2 = b_out.reshape(1, H).astype(jnp.float32)              # (1, H)

    x2d = x.reshape(total_rows, E)
    # Halve the x HBM traffic when the bf16 (16, 128) tiling constraint allows.
    if compute_dtype == jnp.bfloat16 and C % 16 == 0:
        x2d = x2d.astype(compute_dtype)

    kernel = functools.partial(
        _fused_flash_attn_kernel,
        seq_block=Tb, num_sub_blocks=num_sub, is_decoder=is_decoder,
        compute_dtype=compute_dtype,
        approx_recip=(compute_dtype != jnp.float32))

    out2d = pl.pallas_call(
        kernel,
        out_shape=jax.ShapeDtypeStruct((total_rows, H), x.dtype),
        grid_spec=pltpu.PrefetchScalarGridSpec(
            num_scalar_prefetch=0,
            grid=(total_rows // C,),
            in_specs=[
                pl.BlockSpec((C, E), lambda j: (j, 0)),
                pl.BlockSpec((E, H), lambda j: (0, 0)),
                pl.BlockSpec((E, H), lambda j: (0, 0)),
                pl.BlockSpec((E, H), lambda j: (0, 0)),
                pl.BlockSpec((1, H), lambda j: (0, 0)),
            ],
            out_specs=pl.BlockSpec((C, H), lambda j: (j, 0)),
        ),
        compiler_params=pltpu.CompilerParams(
            dimension_semantics=("parallel",),
            vmem_limit_bytes=vmem_limit_bytes),
    )(x2d, wq_t, wk_t, wv_fold, bout2)

    return out2d.reshape(B, S, H)


def _reference_forward(x, w_qkv, w_out, b_out, *, head_size, is_decoder,
                       block_size=128):
    """Pure-JAX (f32) port of the PyTorch module for verification."""
    qkv = x @ w_qkv.T
    q, k, v = jnp.split(qkv, 3, axis=-1)
    B, S, H = q.shape
    Tb = min(block_size, S)
    outs = []
    for i in range(0, S, Tb):
        qb, kb, vb = q[:, i:i + Tb], k[:, i:i + Tb], v[:, i:i + Tb]
        sc = qb @ jnp.swapaxes(kb, -1, -2) / (H ** 0.5)
        if is_decoder:
            tri = jnp.tril(jnp.ones((Tb, Tb), dtype=x.dtype))
            sc = jnp.where(tri == 0, -jnp.inf, sc)
        sc = sc - sc.max(axis=-1, keepdims=True)
        sc = jnp.exp(sc)
        sc = sc / (sc.sum(axis=-1, keepdims=True) + 1e-6)
        outs.append(sc @ vb)
    attn = jnp.concatenate(outs, axis=1)
    return attn @ w_out.T + b_out


if __name__ == "__main__":
    # NOTE: correctness-only shapes.  Any perf tuning (chunk size, compute
    # dtype, buffering) must be measured at production (B, S, E, H).
    batch_size = 2
    seq_len = 8
    embed_dim = 32
    head_size = 16
    context_size = 16        # >= seq_len (the tril buffer)
    is_decoder = True
    block_size = 128         # module default; effective block = min(128, 8) = 8

    key = jax.random.PRNGKey(0)
    kx, kq, kw, kb = jax.random.split(key, 4)

    x = jax.random.normal(kx, (batch_size, seq_len, embed_dim), dtype=jnp.float32)

    qkv_bound = 1.0 / math.sqrt(embed_dim)
    out_bound = 1.0 / math.sqrt(head_size)
    w_qkv = jax.random.uniform(kq, (3 * head_size, embed_dim),
                               minval=-qkv_bound, maxval=qkv_bound,
                               dtype=jnp.float32)
    w_out = jax.random.uniform(kw, (head_size, head_size),
                               minval=-out_bound, maxval=out_bound,
                               dtype=jnp.float32)
    b_out = jax.random.uniform(kb, (head_size,),
                               minval=-out_bound, maxval=out_bound,
                               dtype=jnp.float32)

    ref = _reference_forward(
        x, w_qkv, w_out, b_out,
        head_size=head_size, is_decoder=is_decoder, block_size=block_size)
    ref = jax.block_until_ready(ref)

    # Default (bf16 MXU operands) path — loose tolerance for bf16 rounding.
    out_bf16 = flash_attention_mps_forward(
        x, w_qkv, w_out, b_out,
        head_size=head_size, is_decoder=is_decoder, block_size=block_size,
        compute_dtype=jnp.bfloat16)
    out_bf16 = jax.block_until_ready(out_bf16)
    assert out_bf16.shape == (batch_size, seq_len, head_size)
    assert jnp.allclose(out_bf16, ref, rtol=3e-2, atol=3e-2), (
        f"bf16 max abs err = {jnp.max(jnp.abs(out_bf16 - ref))}")

    # Full-precision path — tight tolerance (only algebraic refactors differ).
    out_f32 = flash_attention_mps_forward(
        x, w_qkv, w_out, b_out,
        head_size=head_size, is_decoder=is_decoder, block_size=block_size,
        compute_dtype=jnp.float32)
    out_f32 = jax.block_until_ready(out_f32)
    assert jnp.allclose(out_f32, ref, rtol=1e-4, atol=1e-4), (
        f"f32 max abs err = {jnp.max(jnp.abs(out_f32 - ref))}")

    print("KERNEL_OK")
</pallas_src>

<mosaic_0001>
module attributes {stable_mosaic.version = 11 : i64} {
  func.func @_fused_flash_attn_kernel(%arg0: i32, %arg1: memref<16x32xbf16, #tpu.memory_space<vmem>>, %arg2: memref<32x16xbf16, #tpu.memory_space<vmem>>, %arg3: memref<32x16xbf16, #tpu.memory_space<vmem>>, %arg4: memref<32x16xbf16, #tpu.memory_space<vmem>>, %arg5: memref<1x16xf32, #tpu.memory_space<vmem>>, %arg6: memref<16x16xf32, #tpu.memory_space<vmem>>) attributes {dimension_semantics = [#tpu.dimension_semantics<parallel>], iteration_bounds = array<i64: 1>, scalar_prefetch = 0 : i64, scratch_operands = 0 : i64, tpu.core_type = #tpu.core_type<tc>, window_params = [{transform_indices = @transform_0, window_bounds = array<i64: 16, 32>}, {pipeline_mode = #tpu.pipeline_mode<synchronous>, transform_indices = @transform_1, window_bounds = array<i64: 32, 16>}, {pipeline_mode = #tpu.pipeline_mode<synchronous>, transform_indices = @transform_2, window_bounds = array<i64: 32, 16>}, {pipeline_mode = #tpu.pipeline_mode<synchronous>, transform_indices = @transform_3, window_bounds = array<i64: 32, 16>}, {pipeline_mode = #tpu.pipeline_mode<synchronous>, transform_indices = @transform_4, window_bounds = array<i64: 1, 16>}, {transform_indices = @transform_5, window_bounds = array<i64: 16, 16>}]} {
    %c0 = arith.constant 0 : index
    %c0_0 = arith.constant 0 : index
    %0 = vector.load %arg1[%c0, %c0_0] : memref<16x32xbf16, #tpu.memory_space<vmem>>, vector<16x32xbf16>
    %c0_1 = arith.constant 0 : index
    %c0_2 = arith.constant 0 : index
    %1 = vector.load %arg2[%c0_1, %c0_2] : memref<32x16xbf16, #tpu.memory_space<vmem>>, vector<32x16xbf16>
    %cst = arith.constant dense<0.000000e+00> : vector<16x16xf32>
    %2 = tpu.matmul %0, %1, %cst {dimension_numbers = #tpu.dot_dimension_numbers<[1], [0], [0], [1], [0, 0, 1, 1], [], []>} : vector<16x32xbf16>, vector<32x16xbf16>, vector<16x16xf32> -> vector<16x16xf32>
    %c0_3 = arith.constant 0 : index
    %c0_4 = arith.constant 0 : index
    %3 = vector.load %arg3[%c0_3, %c0_4] : memref<32x16xbf16, #tpu.memory_space<vmem>>, vector<32x16xbf16>
    %cst_5 = arith.constant dense<0.000000e+00> : vector<16x16xf32>
    %4 = tpu.matmul %0, %3, %cst_5 {dimension_numbers = #tpu.dot_dimension_numbers<[1], [0], [0], [1], [0, 0, 1, 1], [], []>} : vector<16x32xbf16>, vector<32x16xbf16>, vector<16x16xf32> -> vector<16x16xf32>
    %c0_6 = arith.constant 0 : index
    %c0_7 = arith.constant 0 : index
    %5 = vector.load %arg4[%c0_6, %c0_7] : memref<32x16xbf16, #tpu.memory_space<vmem>>, vector<32x16xbf16>
    %cst_8 = arith.constant dense<0.000000e+00> : vector<16x16xf32>
    %6 = tpu.matmul %0, %5, %cst_8 {dimension_numbers = #tpu.dot_dimension_numbers<[1], [0], [0], [1], [0, 0, 1, 1], [], []>} : vector<16x32xbf16>, vector<32x16xbf16>, vector<16x16xf32> -> vector<16x16xf32>
    %c0_9 = arith.constant 0 : index
    %c0_10 = arith.constant 0 : index
    %7 = vector.load %arg5[%c0_9, %c0_10] : memref<1x16xf32, #tpu.memory_space<vmem>>, vector<1x16xf32>
    %8 = vector.shape_cast %7 : vector<1x16xf32> to vector<16xf32>
    %9 = vector.extract_strided_slice %2 {offsets = [0, 0], sizes = [8, 16], strides = [1, 1]} : vector<16x16xf32> to vector<8x16xf32>
    %10 = arith.truncf %9 : vector<8x16xf32> to vector<8x16xbf16>
    %11 = vector.extract_strided_slice %4 {offsets = [0, 0], sizes = [8, 16], strides = [1, 1]} : vector<16x16xf32> to vector<8x16xf32>
    %12 = arith.truncf %11 : vector<8x16xf32> to vector<8x16xbf16>
    %13 = vector.extract_strided_slice %6 {offsets = [0, 0], sizes = [8, 16], strides = [1, 1]} : vector<16x16xf32> to vector<8x16xf32>
    %14 = arith.truncf %13 : vector<8x16xf32> to vector<8x16xbf16>
    %cst_11 = arith.constant dense<0.000000e+00> : vector<8x8xf32>
    %15 = tpu.matmul %10, %12, %cst_11 {dimension_numbers = #tpu.dot_dimension_numbers<[1], [1], [0], [0], [0, 0, 1, 0], [], []>} : vector<8x16xbf16>, vector<8x16xbf16>, vector<8x8xf32> -> vector<8x8xf32>
    %16 = tpu.iota {dimensions = array<i32: 0>} : vector<8x8xi32>
    %17 = tpu.iota {dimensions = array<i32: 1>} : vector<8x8xi32>
    %18 = arith.cmpi sge, %16, %17 : vector<8x8xi32>
    %cst_12 = arith.constant 0xFF800000 : f32
    %19 = vector.broadcast %cst_12 : f32 to vector<8x8xf32>
    %20 = arith.select %18, %15, %19 : vector<8x8xi1>, vector<8x8xf32>
    %cst_13 = arith.constant dense<0xFF800000> : vector<8xf32>
    %21 = vector.multi_reduction <maximumf>, %20, %cst_13 [1] : vector<8x8xf32> to vector<8xf32>
    %22 = vector.shape_cast %21 : vector<8xf32> to vector<8x1xf32>
    %23 = vector.broadcast %22 : vector<8x1xf32> to vector<8x8xf32>
    %24 = arith.subf %20, %23 : vector<8x8xf32>
    %25 = math.exp %24 : vector<8x8xf32>
    %cst_14 = arith.constant dense<0.000000e+00> : vector<8xf32>
    %26 = vector.multi_reduction <add>, %25, %cst_14 [1] : vector<8x8xf32> to vector<8xf32>
    %27 = vector.shape_cast %26 : vector<8xf32> to vector<8x1xf32>
    %cst_15 = arith.constant 9.99999997E-7 : f32
    %28 = vector.broadcast %cst_15 : f32 to vector<8x1xf32>
    %29 = arith.addf %27, %28 : vector<8x1xf32>
    %30 = tpu.reciprocal %29 {approx = true} : vector<8x1xf32> -> vector<8x1xf32>
    %31 = vector.broadcast %30 : vector<8x1xf32> to vector<8x8xf32>
    %32 = arith.mulf %25, %31 : vector<8x8xf32>
    %33 = arith.truncf %32 : vector<8x8xf32> to vector<8x8xbf16>
    %cst_16 = arith.constant dense<0.000000e+00> : vector<8x16xf32>
    %34 = tpu.matmul %33, %14, %cst_16 {dimension_numbers = #tpu.dot_dimension_numbers<[1], [0], [0], [1], [0, 0, 1, 1], [], []>} : vector<8x8xbf16>, vector<8x16xbf16>, vector<8x16xf32> -> vector<8x16xf32>
    %35 = vector.shape_cast %8 : vector<16xf32> to vector<1x16xf32>
    %36 = vector.broadcast %35 : vector<1x16xf32> to vector<8x16xf32>
    %37 = arith.addf %34, %36 : vector<8x16xf32>
    %c0_17 = arith.constant 0 : index
    %c0_18 = arith.constant 0 : index
    %38 = vector.load %arg6[%c0_17, %c0_18] : memref<16x16xf32, #tpu.memory_space<vmem>>, vector<8x16xf32>
    tpu.vector_store %arg6[%c0_17, %c0_18], %37 {strides = array<i32>} : memref<16x16xf32, #tpu.memory_space<vmem>>, vector<8x16xf32>,
    %39 = vector.extract_strided_slice %2 {offsets = [8, 0], sizes = [8, 16], strides = [1, 1]} : vector<16x16xf32> to vector<8x16xf32>
    %40 = arith.truncf %39 : vector<8x16xf32> to vector<8x16xbf16>
    %41 = vector.extract_strided_slice %4 {offsets = [8, 0], sizes = [8, 16], strides = [1, 1]} : vector<16x16xf32> to vector<8x16xf32>
    %42 = arith.truncf %41 : vector<8x16xf32> to vector<8x16xbf16>
    %43 = vector.extract_strided_slice %6 {offsets = [8, 0], sizes = [8, 16], strides = [1, 1]} : vector<16x16xf32> to vector<8x16xf32>
    %44 = arith.truncf %43 : vector<8x16xf32> to vector<8x16xbf16>
    %cst_19 = arith.constant dense<0.000000e+00> : vector<8x8xf32>
    %45 = tpu.matmul %40, %42, %cst_19 {dimension_numbers = #tpu.dot_dimension_numbers<[1], [1], [0], [0], [0, 0, 1, 0], [], []>} : vector<8x16xbf16>, vector<8x16xbf16>, vector<8x8xf32> -> vector<8x8xf32>
    %46 = tpu.iota {dimensions = array<i32: 0>} : vector<8x8xi32>
    %47 = tpu.iota {dimensions = array<i32: 1>} : vector<8x8xi32>
    %48 = arith.cmpi sge, %46, %47 : vector<8x8xi32>
    %cst_20 = arith.constant 0xFF800000 : f32
    %49 = vector.broadcast %cst_20 : f32 to vector<8x8xf32>
    %50 = arith.select %48, %45, %49 : vector<8x8xi1>, vector<8x8xf32>
    %cst_21 = arith.constant dense<0xFF800000> : vector<8xf32>
    %51 = vector.multi_reduction <maximumf>, %50, %cst_21 [1] : vector<8x8xf32> to vector<8xf32>
    %52 = vector.shape_cast %51 : vector<8xf32> to vector<8x1xf32>
    %53 = vector.broadcast %52 : vector<8x1xf32> to vector<8x8xf32>
    %54 = arith.subf %50, %53 : vector<8x8xf32>
    %55 = math.exp %54 : vector<8x8xf32>
    %cst_22 = arith.constant dense<0.000000e+00> : vector<8xf32>
    %56 = vector.multi_reduction <add>, %55, %cst_22 [1] : vector<8x8xf32> to vector<8xf32>
    %57 = vector.shape_cast %56 : vector<8xf32> to vector<8x1xf32>
    %cst_23 = arith.constant 9.99999997E-7 : f32
    %58 = vector.broadcast %cst_23 : f32 to vector<8x1xf32>
    %59 = arith.addf %57, %58 : vector<8x1xf32>
    %60 = tpu.reciprocal %59 {approx = true} : vector<8x1xf32> -> vector<8x1xf32>
    %61 = vector.broadcast %60 : vector<8x1xf32> to vector<8x8xf32>
    %62 = arith.mulf %55, %61 : vector<8x8xf32>
    %63 = arith.truncf %62 : vector<8x8xf32> to vector<8x8xbf16>
    %cst_24 = arith.constant dense<0.000000e+00> : vector<8x16xf32>
    %64 = tpu.matmul %63, %44, %cst_24 {dimension_numbers = #tpu.dot_dimension_numbers<[1], [0], [0], [1], [0, 0, 1, 1], [], []>} : vector<8x8xbf16>, vector<8x16xbf16>, vector<8x16xf32> -> vector<8x16xf32>
    %65 = vector.shape_cast %8 : vector<16xf32> to vector<1x16xf32>
    %66 = vector.broadcast %65 : vector<1x16xf32> to vector<8x16xf32>
    %67 = arith.addf %64, %66 : vector<8x16xf32>
    %c8 = arith.constant 8 : index
    %c0_25 = arith.constant 0 : index
    %68 = vector.load %arg6[%c8, %c0_25] : memref<16x16xf32, #tpu.memory_space<vmem>>, vector<8x16xf32>
    tpu.vector_store %arg6[%c8, %c0_25], %67 {strides = array<i32>} : memref<16x16xf32, #tpu.memory_space<vmem>>, vector<8x16xf32>,
    return
  }
  func.func @transform_0(%arg0: i32) -> (i32, i32) {
    %c0_i32 = arith.constant 0 : i32
    %c0_i32_0 = arith.constant 0 : i32
    return %arg0, %c0_i32 : i32, i32
  }
  func.func @transform_1(%arg0: i32) -> (i32, i32) {
    %c0_i32 = arith.constant 0 : i32
    %c0_i32_0 = arith.constant 0 : i32
    %c0_i32_1 = arith.constant 0 : i32
    return %c0_i32, %c0_i32_0 : i32, i32
  }
  func.func @transform_2(%arg0: i32) -> (i32, i32) {
    %c0_i32 = arith.constant 0 : i32
    %c0_i32_0 = arith.constant 0 : i32
    %c0_i32_1 = arith.constant 0 : i32
    return %c0_i32, %c0_i32_0 : i32, i32
  }
  func.func @transform_3(%arg0: i32) -> (i32, i32) {
    %c0_i32 = arith.constant 0 : i32
    %c0_i32_0 = arith.constant 0 : i32
    %c0_i32_1 = arith.constant 0 : i32
    return %c0_i32, %c0_i32_0 : i32, i32
  }
  func.func @transform_4(%arg0: i32) -> (i32, i32) {
    %c0_i32 = arith.constant 0 : i32
    %c0_i32_0 = arith.constant 0 : i32
    %c0_i32_1 = arith.constant 0 : i32
    return %c0_i32, %c0_i32_0 : i32, i32
  }
  func.func @transform_5(%arg0: i32) -> (i32, i32) {
    %c0_i32 = arith.constant 0 : i32
    %c0_i32_0 = arith.constant 0 : i32
    return %arg0, %c0_i32 : i32, i32
  }
}

</mosaic_0001>

<bundles_post_ra>
// kernel: tpu_custom_call.1
= control target key start
LH: loop header
LB: loop body
LE: loop exit
PB: predicated region body
PF: predicated region fallthrough
CT: control target
= control target key end

     0   :  { %v579_v1 = vmov 0.0   ;;  %vm580_vm0 = vmmov 0   ;;  %vm45_vm1 = vcmask 261120   ;;  %s689_s0 = inlined_call_operand.vmem [shape: bf16[16,32], index: 0, kind: input, shape index: {}]   ;;  %s690_s1 = inlined_call_operand.vmem [shape: bf16[32,16], index: 1, kind: input, shape index: {}]   ;;  %s691_s2 = inlined_call_operand.vmem [shape: bf16[32,16], index: 2, kind: input, shape index: {}]   ;;  %s692_s3 = inlined_call_operand.vmem [shape: bf16[32,16], index: 3, kind: input, shape index: {}]   ;;  %s693_s4 = inlined_call_operand.vmem [shape: f32[1,16], index: 4, kind: input, shape index: {}]   ;;  %s694_s5 = inlined_call_operand.hbm [shape: f32[16,16], index: 5, kind: output, shape index: {}]  }
   0x1   :  { %v540_v0 = vld [vmem:[%s691_s2] sm:$0xff]   ;;  %495 = vmatprep.subr.bf16.mxu1 %v579_v1  ;;  %v541_v2 = vld [vmem:[%s691_s2 + $0x8] sm:$0xff]   ;;  %487 = vmatprep.subr.bf16.mxu0 %v579_v1 }
   0x2   :  { %496 = vmatpush3.bf16.msra.mxu1 %v540_v0  ;;  %v542_v3 = vld [vmem:[%s690_s1] sm:$0xff]   ;;  %499 = vmatprep.mubr.msk.bf16.mxu1 %vm580_vm0, %v579_v1  ;;  %v544_v5 = vld [vmem:[%s690_s1 + $0x8] sm:$0xff]  }
   0x3   :  { %497 = vmatprep.subr.bf16.mxu1 %v579_v1  ;;  %v543_v4 = vld [vmem:[%s689_s0] sm:$0xff]   ;;  %491 = vmatprep.mubr.msk.bf16.mxu0 %vm580_vm0, %v579_v1 }
   0x4   :  { %488 = vmatpush3.bf16.msra.mxu0 %v542_v3 }
   0x5   :  { %489 = vmatprep.subr.bf16.mxu0 %v579_v1 }
   0x6   :  { %498 = vmatpush3.bf16.msra.mxu1 %v541_v2 }
   0x7   :  { %10 = vsyncpa [#allocation3], 0  ;;  %511 = vmatprep.subr.bf16.mxu1 %v579_v1  ;;  %vm208_vm2 = vcmask 130048   ;;  %v545_v20 = vld [vmem:[%s692_s3] sm:$0xff]   ;;  %v546_v21 = vld [vmem:[%s692_s3 + $0x8] sm:$0xff]   ;;  %v255_v22 = vlaneseq  ;;  %vm261_vm4 = vcmask 64512  }
   0x8   :  { %490 = vmatpush3.bf16.msra.mxu0 %v544_v5  ;;  %vm284_vm5 = vcmask 1043456   ;;  %v466_v2 = vld [vmem:[%s693_s4] ss:$0 sm:$0xff]  ;;  %s581_s30 = smov [#allocation2]  }
   0x9   :  { %500 = vmatmul.mubr.msk.bf16.vlgmr.msra.gmra.mrb[0].mxu1 %vm45_vm1, %v543_v4  ;;  %503 = vmatprep.subr.bf16.mxu0 %v579_v1  ;;  %v256_v23 = vshrl.u32 %v255_v22, 7  ;;  %v258_v24 = vand.u32 127, %v255_v22  ;;  %s444_s6 = sshll.u32 %s581_s30, 4  ;;  %s445_s6 = int_to_ptr.vmem [resolvable:$true] %s444_s6 }
   0xa   :  { %513 = vmatprep.mubr.msk.bf16.mxu1 %vm580_vm0, %v579_v1  ;;  %s555_s7 = scalar_lea.vmem %s445_s6, 256  ;;  %p560_p1 = scmp.lt.s32.totalorder %s445_s6, %s445_s6 }
   0xb   :  { %492 = vmatmul.mubr.msk.bf16.vlgmr.msra.gmra.mrb[0].mxu0 %vm45_vm1, %v543_v4  ;;  %vm259_vm3 = vcmp.ge.s32.totalorder %v256_v23, %v258_v24  ;;  %p556_p0 = scmp.ne.s32.totalorder %s445_s6, %s555_s7  ;;  %p561_p2 = scmp.lt.s32.totalorder %s555_s7, %s555_s7 }
   0xc   :  { %507 = vmatprep.mubr.msk.bf16.mxu0 %vm580_vm0, %v579_v1  ;;  %504 = vmatpush3.bf16.msra.mxu0 %v545_v20 }
   0xd   :  { %505 = vmatprep.subr.bf16.mxu0 %v579_v1  ;;  %p562_p3 = por %p561_p2, %p560_p1 }
   0xf   :  { %p563_p4 = pnand %p562_p3, %p556_p0 }
  0x10   :  { %506 = vmatpush3.bf16.msra.mxu0 %v546_v21 }
  0x11   :  { %517 = vmatprep.subr.bf16.mxu0 %v579_v1 }
  0x13   :  { %508 = vmatmul.mubr.msk.bf16.vlgmr.msra.gmra.mrb[4].mxu0 %vm45_vm1, %v543_v4 }
  0x14   :  { %519 = vmatprep.mubr.msk.bf16.mxu0 %vm580_vm0, %v579_v1 }
  0xdc   :  { %v140_v6 = vpop.f32.mrb[0].mxu1 }
  0xdd   :  { %v206_v7 = vpack.c.bf16 %v140_v6, %v140_v6  ;;  %v501_v8 = vpop.f32.mrb[1].mxu1 }
  0xde   :  { %v143_v9 = vpop.f32.mrb[2].mxu1  ;;  %v83_v10 = vpop.f32.mrb[0].mxu0 }
  0xdf   :  { %v213_v11 = vsel %vm208_vm2, %v206_v7, 0  ;;  %v502_v12 = vpop.f32.mrb[3].mxu1  ;;  %v493_v13 = vpop.f32.mrb[1].mxu0  ;;  %v330_v16 = vpack.c.bf16 %v143_v9, %v143_v9  ;;  %v205_v17 = vpack.c.bf16 %v83_v10, %v83_v10 }
  0xe0   :  { %512 = vmatpush3.bf16.xpose.msra.mxu1 %v213_v11  ;;  %v86_v14 = vpop.f32.mrb[2].mxu0 }
  0xe1   :  { %v494_v15 = vpop.f32.mrb[3].mxu0  ;;  %523 = vmatprep.subr.bf16.mxu1 %v579_v1  ;;  %v336_v18 = vsel %vm208_vm2, %v330_v16, 0  ;;  %v329_v19 = vpack.c.bf16 %v86_v14, %v86_v14 }
  0xe6   :  { %v197_v47 = vpop.f32.mrb[4].mxu0 }
  0xe7   :  { %514 = vmatmul.mubr.msk.bf16.vlgmr.msra.gmra.mrb[4].mxu1 %vm208_vm2, %v205_v17  ;;  %v509_v48 = vpop.f32.mrb[5].mxu0  ;;  %v207_v50 = vpack.c.bf16 %v197_v47, %v197_v47 }
  0xe8   :  { %524 = vmatpush3.bf16.xpose.msra.mxu1 %v336_v18  ;;  %525 = vmatprep.mubr.msk.bf16.mxu1 %vm580_vm0, %v579_v1  ;;  %v200_v49 = vpop.f32.mrb[6].mxu0 }
  0xe9   :  { %v510_v51 = vpop.f32.mrb[7].mxu0  ;;  %v331_v52 = vpack.c.bf16 %v200_v49, %v200_v49  ;;  %v286_v53 = vsel %vm284_vm5, %v207_v50, 0 }
  0xea   :  { %518 = vmatpush3.bf16.msra.mxu0 %v286_v53 }
  0xeb   :  { %v396_v54 = vsel %vm284_vm5, %v331_v52, 0  ;;  %529 = vmatprep.subr.bf16.mxu0 %v579_v1 }
  0xef   :  { %526 = vmatmul.mubr.msk.bf16.vlgmr.msra.gmra.mrb[8].mxu1 %vm208_vm2, %v329_v19 }
 0x1ba   :  { %v249_v25 = vpop.f32.mrb[4].mxu1 }
 0x1bb   :  { %v260_v26 = vsel %vm259_vm3, %v249_v25, -inf  ;;  %v515_v27 = vpop.f32.mrb[5].mxu1 }
 0x1bc   :  { %v252_v28 = vpop.f32.mrb[6].mxu1  ;;  %v262_v29 = vsel %vm261_vm4, %v260_v26, -inf }
 0x1bd   :  { %263 = vmax.xlane.f32.xlu0 %v262_v29  ;;  %v516_v30 = vpop.f32.mrb[7].mxu1 }
 0x1c2   :  { %v372_v31 = vpop.f32.mrb[8].mxu1 }
 0x1c3   :  { %v378_v32 = vsel %vm259_vm3, %v372_v31, -inf  ;;  %v527_v33 = vpop.f32.mrb[9].mxu1 }
 0x1c4   :  { %v375_v34 = vpop.f32.mrb[10].mxu1  ;;  %v379_v35 = vsel %vm261_vm4, %v378_v32, -inf }
 0x1c5   :  { %380 = vmax.xlane.f32.xlu0 %v379_v35  ;;  %v528_v36 = vpop.f32.mrb[11].mxu1 }
 0x24a   :  { %v264_v37 = vpop.xlane.xlu0 %263 }
 0x24b   :  { %v265_v38 = vsub.f32 %v260_v26, %v264_v37 }
 0x24d   :  { %v266_v39 = vmul.f32 1.442695, %v265_v38 }
 0x24f   :  { %547 = vpow2.f32 %v266_v39 }
 0x252   :  { %v381_v40 = vpop.xlane.xlu0 %380 }
 0x253   :  { %v382_v41 = vsub.f32 %v378_v32, %v381_v40 }
 0x255   :  { %v383_v42 = vmul.f32 1.442695, %v382_v41 }
 0x257   :  { %549 = vpow2.f32 %v383_v42 }
 0x259   :  { %v548_v43 = vpop.eup %547 }
 0x25a   :  { %v268_v44 = vsel %vm261_vm4, %v548_v43, 0.0 }
 0x25b   :  { %269 = vadd.xlane.f32.xlu1 %v268_v44 }
 0x261   :  { %v550_v45 = vpop.eup %549 }
 0x262   :  { %v385_v46 = vsel %vm261_vm4, %v550_v45, 0.0 }
 0x263   :  { %386 = vadd.xlane.f32.xlu1 %v385_v46 }
 0x2e8   :  { %v270_v55 = vpop.xlane.xlu1 %269 }
 0x2e9   :  { %v271_v56 = vadd.f32 1e-06, %v270_v55 }
 0x2eb   :  { %551 = vrcp.f32 %v271_v56 }
 0x2f0   :  { %v387_v57 = vpop.xlane.xlu1 %386 }
 0x2f1   :  { %v388_v58 = vadd.f32 1e-06, %v387_v57 }
 0x2f3   :  { %553 = vrcp.f32 %v388_v58 }
 0x2f5   :  { %v552_v59 = vpop.eup %551 }
 0x2f6   :  { %v273_v60 = vmul.f32 %v552_v59, %v548_v43 }
 0x2f8   :  { %v274_v61 = vpack.c.bf16 %v273_v60, %v273_v60 }
 0x2fa   :  { %520 = vmatmul.mubr.msk.bf16.vlgmr.msra.gmra.mrb[8].mxu0 %vm261_vm4, %v274_v61 }
 0x2fb   :  { %530 = vmatpush3.bf16.msra.mxu0 %v396_v54  ;;  %531 = vmatprep.mubr.msk.bf16.mxu0 %vm580_vm0, %v579_v1 }
 0x2fd   :  { %v554_v62 = vpop.eup %553 }
 0x2fe   :  { %v390_v63 = vmul.f32 %v554_v62, %v550_v45 }
 0x300   :  { %v391_v0 = vpack.c.bf16 %v390_v63, %v390_v63 }
 0x302   :  { %532 = vmatmul.mubr.msk.bf16.vlgmr.msra.gmra.mrb[12].mxu0 %vm261_vm4, %v391_v0 }
 0x3cd   :  { %v322_v3 = vpop.f32.mrb[8].mxu0 }
 0x3ce   :  { %v323_v4 = vadd.f32 %v466_v2, %v322_v3  ;;  %v521_v5 = vpop.f32.mrb[9].mxu0 }
 0x3cf   :  { %v325_v6 = vpop.f32.mrb[10].mxu0 }
 0x3d0   :  { %328 = vst.msk [vmem:[#allocation2] sm:$0xff] %vm208_vm2, %v323_v4  ;;  %v522_v7 = vpop.f32.mrb[11].mxu0 }
 0x3d5   :  { %v432_v8 = vpop.f32.mrb[12].mxu0 }
 0x3d6   :  { %v433_v1 = vadd.f32 %v466_v2, %v432_v8  ;;  %v533_v9 = vpop.f32.mrb[13].mxu0 }
 0x3d7   :  { %v435_v10 = vpop.f32.mrb[14].mxu0 }
 0x3d8   :  { %438 = vst.msk [vmem:[#allocation2 + $0x8] sm:$0xff] %vm208_vm2, %v433_v1  ;;  %v534_v11 = vpop.f32.mrb[15].mxu0 }
 0x3d9   :  { %566 = shalt.err (!%p563_p4)
}
 0x3da   :  { %s567_s9 = scalar_lea.hbm %s694_s5, 256 }
 0x3db   :  { %p568_p5 = scmp.ne.s32.totalorder %s694_s5, %s567_s9  ;;  %p571_p6 = scmp.lt.u32.totalorder %s567_s9, %s694_s5 }
 0x3dd   :  { %p573_p7 = pnand %p571_p6, %p568_p5 }
 0x3df   :  { %576 = shalt.err (!%p573_p7)
}
 0x3e0   :  { %s582_s14 = smov 128   ;;  %s583_s15 = smov 8  }
 0x3e1   :  { %450 = dma.vmem_to_hbm [thread:$0]  %s445_s6, 256, %s694_s5, [#allocation3], %s582_s14, %s582_s14, %s583_s15  }
 0x3e2   :  { %577 = dma.done.wait [#allocation3], 256  }
 0x3e3   :  { %578 = vsyncadd [#allocation3], 4294967040 }
 0x3e4   :  { %454 = vsyncpa [#allocation3], 1 }

</bundles_post_ra>
